<compile_context>
chip_gen: v5e
topology: v5e:2x2
jax: 0.10.0
libtpu: 0.0.40
codegen_flags: <defaults>
</compile_context>

<pallas_src>
import functools

import jax
import jax.numpy as jnp
from jax import lax
from jax.experimental import pallas as pl
from jax.experimental.pallas import tpu as pltpu


def _block_kernel(x_ref, bias_ref,
                  ln1g_ref, ln1b_ref,
                  wqkv_ref, wp_ref, bp_ref,
                  ln2g_ref, ln2b_ref,
                  w1_ref, b1_ref, w2_ref, b2_ref,
                  out_ref,
                  attn_acc_ref,
                  *, n_head):
    """One batch element of: x + MHA(LN1(x)); then + FFN(LN2(.))."""
    x = x_ref[0]                                   # (T, C) f32
    T, C = x.shape
    hs = C // n_head
    eps = 1e-5

    # ---------------- LayerNorm 1 (f32) ----------------
    mean1 = jnp.mean(x, axis=-1, keepdims=True)
    var1 = jnp.mean(jnp.square(x - mean1), axis=-1, keepdims=True)
    h1 = (x - mean1) * lax.rsqrt(var1 + eps) * ln1g_ref[0] + ln1b_ref[0]

    # ---------------- fused QKV projection: one (T,C)@(C,3C) matmul ----------
    qkv = jnp.dot(h1.astype(jnp.bfloat16), wqkv_ref[...],
                  preferred_element_type=jnp.float32)       # (T, 3C) f32
    q = qkv[:, 0 * C:1 * C]
    k = qkv[:, 1 * C:2 * C]
    v = qkv[:, 2 * C:3 * C]

    scale = C ** -0.5                   # matches the PyTorch reference (C, not hs)
    bias = bias_ref[...]                # (T, T) additive causal bias (0 / -1e30)

    # ---------------- per-head causal attention (static unroll) --------------
    for h in range(n_head):
        sl = slice(h * hs, (h + 1) * hs)
        qh = q[:, sl].astype(jnp.bfloat16)                  # (T, hs)
        kh = k[:, sl].astype(jnp.bfloat16)
        vh = v[:, sl].astype(jnp.bfloat16)
        # scores: q @ k^T without explicit transpose (contract last dims)
        s = lax.dot_general(qh, kh, (((1,), (1,)), ((), ())),
                            preferred_element_type=jnp.float32)  # (T, T)
        s = s * scale + bias
        m = jnp.max(s, axis=-1, keepdims=True)
        e = jnp.exp(s - m)
        inv = pl.reciprocal(jnp.sum(e, axis=-1, keepdims=True), approx=True)
        oh = jnp.dot(e.astype(jnp.bfloat16), vh,
                     preferred_element_type=jnp.float32) * inv    # (T, hs)
        attn_acc_ref[:, sl] = oh        # head-concat via static-offset stores

    # single (T,C)@(C,C) output projection over the concatenated heads
    attn = jnp.dot(attn_acc_ref[...].astype(jnp.bfloat16), wp_ref[...],
                   preferred_element_type=jnp.float32) + bp_ref[0]

    x1 = x + attn                                   # residual 1 (f32)

    # ---------------- LayerNorm 2 (f32) ----------------
    mean2 = jnp.mean(x1, axis=-1, keepdims=True)
    var2 = jnp.mean(jnp.square(x1 - mean2), axis=-1, keepdims=True)
    h2 = (x1 - mean2) * lax.rsqrt(var2 + eps) * ln2g_ref[0] + ln2b_ref[0]

    # ---------------- FeedForward: Linear -> ReLU -> Linear ----------------
    ff = jnp.dot(h2.astype(jnp.bfloat16), w1_ref[...],
                 preferred_element_type=jnp.float32) + b1_ref[0]
    ff = jnp.maximum(ff, 0.0)
    ff = jnp.dot(ff.astype(jnp.bfloat16), w2_ref[...],
                 preferred_element_type=jnp.float32) + b2_ref[0]

    out_ref[0] = (x1 + ff).astype(out_ref.dtype)    # residual 2


def transformer_block(x, params, *, n_head):
    """x: (B, T, C) float32.  params: dict of f32 weights (see init_params)."""
    B, T, C = x.shape
    F = params['w1'].shape[1]

    bf16 = jnp.bfloat16
    # fuse Q/K/V into one (C, 3C) weight; matmul weights -> bf16 (f32 accumulate)
    wqkv = jnp.concatenate([params['wq'], params['wk'], params['wv']],
                           axis=1).astype(bf16)             # (C, 3C)
    wp = params['wp'].astype(bf16)                          # (C, C)
    w1 = params['w1'].astype(bf16)                          # (C, F)
    w2 = params['w2'].astype(bf16)                          # (F, C)

    # causal additive bias, built once on the host (finite, so no -inf NaN risk)
    bias = jnp.where(jnp.tril(jnp.ones((T, T), jnp.bool_)),
                     0.0, -1e30).astype(jnp.float32)

    full = lambda shape: pl.BlockSpec(shape, lambda b: (0,) * len(shape))

    in_specs = [
        pl.BlockSpec((1, T, C), lambda b: (b, 0, 0)),   # x
        full((T, T)),                                   # causal bias
        full((1, C)), full((1, C)),                     # ln1 gamma/beta
        full((C, 3 * C)),                               # fused Wqkv (bf16)
        full((C, C)), full((1, C)),                     # Wproj (bf16), bproj
        full((1, C)), full((1, C)),                     # ln2 gamma/beta
        full((C, F)), full((1, F)),                     # W1 (bf16), b1
        full((F, C)), full((1, C)),                     # W2 (bf16), b2
    ]

    # VMEM budget: double-buffered bf16 weights + per-step activations, 3x margin.
    weight_bytes = 2 * 2 * (wqkv.size + wp.size + w1.size + w2.size)
    act_bytes = 4 * (6 * T * C + 3 * T * C + T * F + 2 * T * T)
    vmem_limit = int(min(max(3 * (weight_bytes + act_bytes), 16 * 1024 * 1024),
                         64 * 1024 * 1024))

    kernel = functools.partial(_block_kernel, n_head=n_head)

    return pl.pallas_call(
        kernel,
        out_shape=jax.ShapeDtypeStruct((B, T, C), x.dtype),
        grid_spec=pltpu.PrefetchScalarGridSpec(
            num_scalar_prefetch=0,
            grid=(B,),
            in_specs=in_specs,
            out_specs=pl.BlockSpec((1, T, C), lambda b: (b, 0, 0)),
            scratch_shapes=[pltpu.VMEM((T, C), jnp.float32)],  # head-concat buffer
        ),
        compiler_params=pltpu.CompilerParams(
            dimension_semantics=("parallel",),
            vmem_limit_bytes=vmem_limit),
    )(x, bias,
      params['ln1_g'], params['ln1_b'],
      wqkv, wp, params['bp'],
      params['ln2_g'], params['ln2_b'],
      w1, params['b1'],
      w2, params['b2'])


def init_params(key, n_embd, n_head):
    """Deterministic synthetic parameters matching the PyTorch module shapes."""
    head_size = n_embd // n_head
    ks = jax.random.split(key, 8)
    scale = 0.02
    f32 = jnp.float32

    # per-head Q/K/V projections (no bias), concatenated along columns -> (C, C)
    def qkv_weight(k):
        per_head = scale * jax.random.normal(k, (n_head, n_embd, head_size), f32)
        return jnp.concatenate([per_head[h] for h in range(n_head)], axis=1)

    wq = qkv_weight(ks[0])
    wk = qkv_weight(ks[1])
    wv = qkv_weight(ks[2])

    # output projection (C, C) + bias
    wp = scale * jax.random.normal(ks[3], (n_embd, n_embd), f32)
    bp = jnp.zeros((1, n_embd), f32)

    # feed-forward
    w1 = scale * jax.random.normal(ks[4], (n_embd, 4 * n_embd), f32)
    b1 = scale * jax.random.normal(ks[5], (1, 4 * n_embd), f32)
    w2 = scale * jax.random.normal(ks[6], (4 * n_embd, n_embd), f32)
    b2 = scale * jax.random.normal(ks[7], (1, n_embd), f32)

    # layer norms (default init: gamma=1, beta=0)
    ln1_g = jnp.ones((1, n_embd), f32)
    ln1_b = jnp.zeros((1, n_embd), f32)
    ln2_g = jnp.ones((1, n_embd), f32)
    ln2_b = jnp.zeros((1, n_embd), f32)

    return dict(ln1_g=ln1_g, ln1_b=ln1_b, wq=wq, wk=wk, wv=wv, wp=wp, bp=bp,
                ln2_g=ln2_g, ln2_b=ln2_b, w1=w1, b1=b1, w2=w2, b2=b2)


if __name__ == "__main__":
    # Block(n_embd=32, n_head=4, block_size=8, dropout=0.0) on x of shape
    # (B=2, T=8, C=32).
    B, T, n_embd, n_head = 2, 8, 32, 4

    key = jax.random.PRNGKey(0)
    kx, kp = jax.random.split(key)
    x = jax.random.normal(kx, (B, T, n_embd), jnp.float32)
    params = init_params(kp, n_embd, n_head)

    out = transformer_block(x, params, n_head=n_head)
    jax.block_until_ready(out)

    assert out.shape == (B, T, n_embd)
    assert bool(jnp.all(jnp.isfinite(out)))
    print("KERNEL_OK")
</pallas_src>

<mosaic_0001>
module attributes {stable_mosaic.version = 11 : i64} {
  func.func @_block_kernel(%arg0: i32, %arg1: memref<1x8x32xf32, #tpu.memory_space<vmem>>, %arg2: memref<8x8xf32, #tpu.memory_space<vmem>>, %arg3: memref<1x32xf32, #tpu.memory_space<vmem>>, %arg4: memref<1x32xf32, #tpu.memory_space<vmem>>, %arg5: memref<32x96xbf16, #tpu.memory_space<vmem>>, %arg6: memref<32x32xbf16, #tpu.memory_space<vmem>>, %arg7: memref<1x32xf32, #tpu.memory_space<vmem>>, %arg8: memref<1x32xf32, #tpu.memory_space<vmem>>, %arg9: memref<1x32xf32, #tpu.memory_space<vmem>>, %arg10: memref<32x128xbf16, #tpu.memory_space<vmem>>, %arg11: memref<1x128xf32, #tpu.memory_space<vmem>>, %arg12: memref<128x32xbf16, #tpu.memory_space<vmem>>, %arg13: memref<1x32xf32, #tpu.memory_space<vmem>>, %arg14: memref<1x8x32xf32, #tpu.memory_space<vmem>>, %arg15: memref<8x32xf32, #tpu.memory_space<vmem>>) attributes {dimension_semantics = [#tpu.dimension_semantics<parallel>], iteration_bounds = array<i64: 2>, scalar_prefetch = 0 : i64, scratch_operands = 1 : i64, tpu.core_type = #tpu.core_type<tc>, window_params = [{transform_indices = @transform_0, window_bounds = array<i64: 1, 8, 32>}, {pipeline_mode = #tpu.pipeline_mode<synchronous>, transform_indices = @transform_1, window_bounds = array<i64: 8, 8>}, {pipeline_mode = #tpu.pipeline_mode<synchronous>, transform_indices = @transform_2, window_bounds = array<i64: 1, 32>}, {pipeline_mode = #tpu.pipeline_mode<synchronous>, transform_indices = @transform_3, window_bounds = array<i64: 1, 32>}, {pipeline_mode = #tpu.pipeline_mode<synchronous>, transform_indices = @transform_4, window_bounds = array<i64: 32, 96>}, {pipeline_mode = #tpu.pipeline_mode<synchronous>, transform_indices = @transform_5, window_bounds = array<i64: 32, 32>}, {pipeline_mode = #tpu.pipeline_mode<synchronous>, transform_indices = @transform_6, window_bounds = array<i64: 1, 32>}, {pipeline_mode = #tpu.pipeline_mode<synchronous>, transform_indices = @transform_7, window_bounds = array<i64: 1, 32>}, {pipeline_mode = #tpu.pipeline_mode<synchronous>, transform_indices = @transform_8, window_bounds = array<i64: 1, 32>}, {pipeline_mode = #tpu.pipeline_mode<synchronous>, transform_indices = @transform_9, window_bounds = array<i64: 32, 128>}, {pipeline_mode = #tpu.pipeline_mode<synchronous>, transform_indices = @transform_10, window_bounds = array<i64: 1, 128>}, {pipeline_mode = #tpu.pipeline_mode<synchronous>, transform_indices = @transform_11, window_bounds = array<i64: 128, 32>}, {pipeline_mode = #tpu.pipeline_mode<synchronous>, transform_indices = @transform_12, window_bounds = array<i64: 1, 32>}, {transform_indices = @transform_13, window_bounds = array<i64: 1, 8, 32>}]} {
    %c0 = arith.constant 0 : index
    %c0_0 = arith.constant 0 : index
    %c0_1 = arith.constant 0 : index
    %0 = vector.load %arg1[%c0, %c0_0, %c0_1] : memref<1x8x32xf32, #tpu.memory_space<vmem>>, vector<1x8x32xf32>
    %1 = vector.shape_cast %0 : vector<1x8x32xf32> to vector<8x32xf32>
    %cst = arith.constant dense<0.000000e+00> : vector<8xf32>
    %2 = vector.multi_reduction <add>, %1, %cst [1] : vector<8x32xf32> to vector<8xf32>
    %3 = vector.shape_cast %2 : vector<8xf32> to vector<8x1xf32>
    %cst_2 = arith.constant 3.200000e+01 : f32
    %4 = vector.broadcast %cst_2 : f32 to vector<8x1xf32>
    %5 = arith.divf %3, %4 : vector<8x1xf32>
    %6 = vector.broadcast %5 : vector<8x1xf32> to vector<8x32xf32>
    %7 = arith.subf %1, %6 : vector<8x32xf32>
    %8 = arith.mulf %7, %7 : vector<8x32xf32>
    %cst_3 = arith.constant dense<0.000000e+00> : vector<8xf32>
    %9 = vector.multi_reduction <add>, %8, %cst_3 [1] : vector<8x32xf32> to vector<8xf32>
    %10 = vector.shape_cast %9 : vector<8xf32> to vector<8x1xf32>
    %cst_4 = arith.constant 3.200000e+01 : f32
    %11 = vector.broadcast %cst_4 : f32 to vector<8x1xf32>
    %12 = arith.divf %10, %11 : vector<8x1xf32>
    %13 = vector.broadcast %5 : vector<8x1xf32> to vector<8x32xf32>
    %14 = arith.subf %1, %13 : vector<8x32xf32>
    %cst_5 = arith.constant 9.99999974E-6 : f32
    %15 = vector.broadcast %cst_5 : f32 to vector<8x1xf32>
    %16 = arith.addf %12, %15 : vector<8x1xf32>
    %17 = math.rsqrt %16 : vector<8x1xf32>
    %18 = vector.broadcast %17 : vector<8x1xf32> to vector<8x32xf32>
    %19 = arith.mulf %14, %18 : vector<8x32xf32>
    %c0_6 = arith.constant 0 : index
    %c0_7 = arith.constant 0 : index
    %20 = vector.load %arg3[%c0_6, %c0_7] : memref<1x32xf32, #tpu.memory_space<vmem>>, vector<1x32xf32>
    %21 = vector.shape_cast %20 : vector<1x32xf32> to vector<32xf32>
    %22 = vector.shape_cast %21 : vector<32xf32> to vector<1x32xf32>
    %23 = vector.broadcast %22 : vector<1x32xf32> to vector<8x32xf32>
    %24 = arith.mulf %19, %23 : vector<8x32xf32>
    %c0_8 = arith.constant 0 : index
    %c0_9 = arith.constant 0 : index
    %25 = vector.load %arg4[%c0_8, %c0_9] : memref<1x32xf32, #tpu.memory_space<vmem>>, vector<1x32xf32>
    %26 = vector.shape_cast %25 : vector<1x32xf32> to vector<32xf32>
    %27 = vector.shape_cast %26 : vector<32xf32> to vector<1x32xf32>
    %28 = vector.broadcast %27 : vector<1x32xf32> to vector<8x32xf32>
    %29 = arith.addf %24, %28 : vector<8x32xf32>
    %30 = arith.truncf %29 : vector<8x32xf32> to vector<8x32xbf16>
    %c0_10 = arith.constant 0 : index
    %c0_11 = arith.constant 0 : index
    %31 = vector.load %arg5[%c0_10, %c0_11] : memref<32x96xbf16, #tpu.memory_space<vmem>>, vector<32x96xbf16>
    %cst_12 = arith.constant dense<0.000000e+00> : vector<8x96xf32>
    %32 = tpu.matmul %30, %31, %cst_12 {dimension_numbers = #tpu.dot_dimension_numbers<[1], [0], [0], [1], [0, 0, 1, 1], [], []>} : vector<8x32xbf16>, vector<32x96xbf16>, vector<8x96xf32> -> vector<8x96xf32>
    %33 = vector.extract_strided_slice %32 {offsets = [0, 0], sizes = [8, 32], strides = [1, 1]} : vector<8x96xf32> to vector<8x32xf32>
    %34 = vector.extract_strided_slice %32 {offsets = [0, 32], sizes = [8, 32], strides = [1, 1]} : vector<8x96xf32> to vector<8x32xf32>
    %35 = vector.extract_strided_slice %32 {offsets = [0, 64], sizes = [8, 32], strides = [1, 1]} : vector<8x96xf32> to vector<8x32xf32>
    %c0_13 = arith.constant 0 : index
    %c0_14 = arith.constant 0 : index
    %36 = vector.load %arg2[%c0_13, %c0_14] : memref<8x8xf32, #tpu.memory_space<vmem>>, vector<8x8xf32>
    %37 = vector.extract_strided_slice %33 {offsets = [0, 0], sizes = [8, 8], strides = [1, 1]} : vector<8x32xf32> to vector<8x8xf32>
    %38 = arith.truncf %37 : vector<8x8xf32> to vector<8x8xbf16>
    %39 = vector.extract_strided_slice %34 {offsets = [0, 0], sizes = [8, 8], strides = [1, 1]} : vector<8x32xf32> to vector<8x8xf32>
    %40 = arith.truncf %39 : vector<8x8xf32> to vector<8x8xbf16>
    %41 = vector.extract_strided_slice %35 {offsets = [0, 0], sizes = [8, 8], strides = [1, 1]} : vector<8x32xf32> to vector<8x8xf32>
    %42 = arith.truncf %41 : vector<8x8xf32> to vector<8x8xbf16>
    %cst_15 = arith.constant dense<0.000000e+00> : vector<8x8xf32>
    %43 = tpu.matmul %38, %40, %cst_15 {dimension_numbers = #tpu.dot_dimension_numbers<[1], [1], [0], [0], [0, 0, 1, 0], [], []>} : vector<8x8xbf16>, vector<8x8xbf16>, vector<8x8xf32> -> vector<8x8xf32>
    %cst_16 = arith.constant 0.176776692 : f32
    %44 = vector.broadcast %cst_16 : f32 to vector<8x8xf32>
    %45 = arith.mulf %43, %44 : vector<8x8xf32>
    %46 = arith.addf %45, %36 : vector<8x8xf32>
    %cst_17 = arith.constant dense<0xFF800000> : vector<8xf32>
    %47 = vector.multi_reduction <maximumf>, %46, %cst_17 [1] : vector<8x8xf32> to vector<8xf32>
    %48 = vector.shape_cast %47 : vector<8xf32> to vector<8x1xf32>
    %49 = vector.broadcast %48 : vector<8x1xf32> to vector<8x8xf32>
    %50 = arith.subf %46, %49 : vector<8x8xf32>
    %51 = math.exp %50 : vector<8x8xf32>
    %cst_18 = arith.constant dense<0.000000e+00> : vector<8xf32>
    %52 = vector.multi_reduction <add>, %51, %cst_18 [1] : vector<8x8xf32> to vector<8xf32>
    %53 = vector.shape_cast %52 : vector<8xf32> to vector<8x1xf32>
    %54 = tpu.reciprocal %53 {approx = true} : vector<8x1xf32> -> vector<8x1xf32>
    %55 = arith.truncf %51 : vector<8x8xf32> to vector<8x8xbf16>
    %cst_19 = arith.constant dense<0.000000e+00> : vector<8x8xf32>
    %56 = tpu.matmul %55, %42, %cst_19 {dimension_numbers = #tpu.dot_dimension_numbers<[1], [0], [0], [1], [0, 0, 1, 1], [], []>} : vector<8x8xbf16>, vector<8x8xbf16>, vector<8x8xf32> -> vector<8x8xf32>
    %57 = vector.broadcast %54 : vector<8x1xf32> to vector<8x8xf32>
    %58 = arith.mulf %56, %57 : vector<8x8xf32>
    %c0_20 = arith.constant 0 : index
    %c0_21 = arith.constant 0 : index
    %59 = vector.load %arg15[%c0_20, %c0_21] : memref<8x32xf32, #tpu.memory_space<vmem>>, vector<8x8xf32>
    tpu.vector_store %arg15[%c0_20, %c0_21], %58 {strides = array<i32>} : memref<8x32xf32, #tpu.memory_space<vmem>>, vector<8x8xf32>,
    %60 = vector.extract_strided_slice %33 {offsets = [0, 8], sizes = [8, 8], strides = [1, 1]} : vector<8x32xf32> to vector<8x8xf32>
    %61 = arith.truncf %60 : vector<8x8xf32> to vector<8x8xbf16>
    %62 = vector.extract_strided_slice %34 {offsets = [0, 8], sizes = [8, 8], strides = [1, 1]} : vector<8x32xf32> to vector<8x8xf32>
    %63 = arith.truncf %62 : vector<8x8xf32> to vector<8x8xbf16>
    %64 = vector.extract_strided_slice %35 {offsets = [0, 8], sizes = [8, 8], strides = [1, 1]} : vector<8x32xf32> to vector<8x8xf32>
    %65 = arith.truncf %64 : vector<8x8xf32> to vector<8x8xbf16>
    %cst_22 = arith.constant dense<0.000000e+00> : vector<8x8xf32>
    %66 = tpu.matmul %61, %63, %cst_22 {dimension_numbers = #tpu.dot_dimension_numbers<[1], [1], [0], [0], [0, 0, 1, 0], [], []>} : vector<8x8xbf16>, vector<8x8xbf16>, vector<8x8xf32> -> vector<8x8xf32>
    %cst_23 = arith.constant 0.176776692 : f32
    %67 = vector.broadcast %cst_23 : f32 to vector<8x8xf32>
    %68 = arith.mulf %66, %67 : vector<8x8xf32>
    %69 = arith.addf %68, %36 : vector<8x8xf32>
    %cst_24 = arith.constant dense<0xFF800000> : vector<8xf32>
    %70 = vector.multi_reduction <maximumf>, %69, %cst_24 [1] : vector<8x8xf32> to vector<8xf32>
    %71 = vector.shape_cast %70 : vector<8xf32> to vector<8x1xf32>
    %72 = vector.broadcast %71 : vector<8x1xf32> to vector<8x8xf32>
    %73 = arith.subf %69, %72 : vector<8x8xf32>
    %74 = math.exp %73 : vector<8x8xf32>
    %cst_25 = arith.constant dense<0.000000e+00> : vector<8xf32>
    %75 = vector.multi_reduction <add>, %74, %cst_25 [1] : vector<8x8xf32> to vector<8xf32>
    %76 = vector.shape_cast %75 : vector<8xf32> to vector<8x1xf32>
    %77 = tpu.reciprocal %76 {approx = true} : vector<8x1xf32> -> vector<8x1xf32>
    %78 = arith.truncf %74 : vector<8x8xf32> to vector<8x8xbf16>
    %cst_26 = arith.constant dense<0.000000e+00> : vector<8x8xf32>
    %79 = tpu.matmul %78, %65, %cst_26 {dimension_numbers = #tpu.dot_dimension_numbers<[1], [0], [0], [1], [0, 0, 1, 1], [], []>} : vector<8x8xbf16>, vector<8x8xbf16>, vector<8x8xf32> -> vector<8x8xf32>
    %80 = vector.broadcast %77 : vector<8x1xf32> to vector<8x8xf32>
    %81 = arith.mulf %79, %80 : vector<8x8xf32>
    %c0_27 = arith.constant 0 : index
    %c8 = arith.constant 8 : index
    %82 = vector.load %arg15[%c0_27, %c8] : memref<8x32xf32, #tpu.memory_space<vmem>>, vector<8x8xf32>
    tpu.vector_store %arg15[%c0_27, %c8], %81 {strides = array<i32>} : memref<8x32xf32, #tpu.memory_space<vmem>>, vector<8x8xf32>,
    %83 = vector.extract_strided_slice %33 {offsets = [0, 16], sizes = [8, 8], strides = [1, 1]} : vector<8x32xf32> to vector<8x8xf32>
    %84 = arith.truncf %83 : vector<8x8xf32> to vector<8x8xbf16>
    %85 = vector.extract_strided_slice %34 {offsets = [0, 16], sizes = [8, 8], strides = [1, 1]} : vector<8x32xf32> to vector<8x8xf32>
    %86 = arith.truncf %85 : vector<8x8xf32> to vector<8x8xbf16>
    %87 = vector.extract_strided_slice %35 {offsets = [0, 16], sizes = [8, 8], strides = [1, 1]} : vector<8x32xf32> to vector<8x8xf32>
    %88 = arith.truncf %87 : vector<8x8xf32> to vector<8x8xbf16>
    %cst_28 = arith.constant dense<0.000000e+00> : vector<8x8xf32>
    %89 = tpu.matmul %84, %86, %cst_28 {dimension_numbers = #tpu.dot_dimension_numbers<[1], [1], [0], [0], [0, 0, 1, 0], [], []>} : vector<8x8xbf16>, vector<8x8xbf16>, vector<8x8xf32> -> vector<8x8xf32>
    %cst_29 = arith.constant 0.176776692 : f32
    %90 = vector.broadcast %cst_29 : f32 to vector<8x8xf32>
    %91 = arith.mulf %89, %90 : vector<8x8xf32>
    %92 = arith.addf %91, %36 : vector<8x8xf32>
    %cst_30 = arith.constant dense<0xFF800000> : vector<8xf32>
    %93 = vector.multi_reduction <maximumf>, %92, %cst_30 [1] : vector<8x8xf32> to vector<8xf32>
    %94 = vector.shape_cast %93 : vector<8xf32> to vector<8x1xf32>
    %95 = vector.broadcast %94 : vector<8x1xf32> to vector<8x8xf32>
    %96 = arith.subf %92, %95 : vector<8x8xf32>
    %97 = math.exp %96 : vector<8x8xf32>
    %cst_31 = arith.constant dense<0.000000e+00> : vector<8xf32>
    %98 = vector.multi_reduction <add>, %97, %cst_31 [1] : vector<8x8xf32> to vector<8xf32>
    %99 = vector.shape_cast %98 : vector<8xf32> to vector<8x1xf32>
    %100 = tpu.reciprocal %99 {approx = true} : vector<8x1xf32> -> vector<8x1xf32>
    %101 = arith.truncf %97 : vector<8x8xf32> to vector<8x8xbf16>
    %cst_32 = arith.constant dense<0.000000e+00> : vector<8x8xf32>
    %102 = tpu.matmul %101, %88, %cst_32 {dimension_numbers = #tpu.dot_dimension_numbers<[1], [0], [0], [1], [0, 0, 1, 1], [], []>} : vector<8x8xbf16>, vector<8x8xbf16>, vector<8x8xf32> -> vector<8x8xf32>
    %103 = vector.broadcast %100 : vector<8x1xf32> to vector<8x8xf32>
    %104 = arith.mulf %102, %103 : vector<8x8xf32>
    %c0_33 = arith.constant 0 : index
    %c16 = arith.constant 16 : index
    %105 = vector.load %arg15[%c0_33, %c16] : memref<8x32xf32, #tpu.memory_space<vmem>>, vector<8x8xf32>
    tpu.vector_store %arg15[%c0_33, %c16], %104 {strides = array<i32>} : memref<8x32xf32, #tpu.memory_space<vmem>>, vector<8x8xf32>,
    %106 = vector.extract_strided_slice %33 {offsets = [0, 24], sizes = [8, 8], strides = [1, 1]} : vector<8x32xf32> to vector<8x8xf32>
    %107 = arith.truncf %106 : vector<8x8xf32> to vector<8x8xbf16>
    %108 = vector.extract_strided_slice %34 {offsets = [0, 24], sizes = [8, 8], strides = [1, 1]} : vector<8x32xf32> to vector<8x8xf32>
    %109 = arith.truncf %108 : vector<8x8xf32> to vector<8x8xbf16>
    %110 = vector.extract_strided_slice %35 {offsets = [0, 24], sizes = [8, 8], strides = [1, 1]} : vector<8x32xf32> to vector<8x8xf32>
    %111 = arith.truncf %110 : vector<8x8xf32> to vector<8x8xbf16>
    %cst_34 = arith.constant dense<0.000000e+00> : vector<8x8xf32>
    %112 = tpu.matmul %107, %109, %cst_34 {dimension_numbers = #tpu.dot_dimension_numbers<[1], [1], [0], [0], [0, 0, 1, 0], [], []>} : vector<8x8xbf16>, vector<8x8xbf16>, vector<8x8xf32> -> vector<8x8xf32>
    %cst_35 = arith.constant 0.176776692 : f32
    %113 = vector.broadcast %cst_35 : f32 to vector<8x8xf32>
    %114 = arith.mulf %112, %113 : vector<8x8xf32>
    %115 = arith.addf %114, %36 : vector<8x8xf32>
    %cst_36 = arith.constant dense<0xFF800000> : vector<8xf32>
    %116 = vector.multi_reduction <maximumf>, %115, %cst_36 [1] : vector<8x8xf32> to vector<8xf32>
    %117 = vector.shape_cast %116 : vector<8xf32> to vector<8x1xf32>
    %118 = vector.broadcast %117 : vector<8x1xf32> to vector<8x8xf32>
    %119 = arith.subf %115, %118 : vector<8x8xf32>
    %120 = math.exp %119 : vector<8x8xf32>
    %cst_37 = arith.constant dense<0.000000e+00> : vector<8xf32>
    %121 = vector.multi_reduction <add>, %120, %cst_37 [1] : vector<8x8xf32> to vector<8xf32>
    %122 = vector.shape_cast %121 : vector<8xf32> to vector<8x1xf32>
    %123 = tpu.reciprocal %122 {approx = true} : vector<8x1xf32> -> vector<8x1xf32>
    %124 = arith.truncf %120 : vector<8x8xf32> to vector<8x8xbf16>
    %cst_38 = arith.constant dense<0.000000e+00> : vector<8x8xf32>
    %125 = tpu.matmul %124, %111, %cst_38 {dimension_numbers = #tpu.dot_dimension_numbers<[1], [0], [0], [1], [0, 0, 1, 1], [], []>} : vector<8x8xbf16>, vector<8x8xbf16>, vector<8x8xf32> -> vector<8x8xf32>
    %126 = vector.broadcast %123 : vector<8x1xf32> to vector<8x8xf32>
    %127 = arith.mulf %125, %126 : vector<8x8xf32>
    %c0_39 = arith.constant 0 : index
    %c24 = arith.constant 24 : index
    %128 = vector.load %arg15[%c0_39, %c24] : memref<8x32xf32, #tpu.memory_space<vmem>>, vector<8x8xf32>
    tpu.vector_store %arg15[%c0_39, %c24], %127 {strides = array<i32>} : memref<8x32xf32, #tpu.memory_space<vmem>>, vector<8x8xf32>,
    %c0_40 = arith.constant 0 : index
    %c0_41 = arith.constant 0 : index
    %129 = vector.load %arg15[%c0_40, %c0_41] : memref<8x32xf32, #tpu.memory_space<vmem>>, vector<8x32xf32>
    %130 = arith.truncf %129 : vector<8x32xf32> to vector<8x32xbf16>
    %c0_42 = arith.constant 0 : index
    %c0_43 = arith.constant 0 : index
    %131 = vector.load %arg6[%c0_42, %c0_43] : memref<32x32xbf16, #tpu.memory_space<vmem>>, vector<32x32xbf16>
    %cst_44 = arith.constant dense<0.000000e+00> : vector<8x32xf32>
    %132 = tpu.matmul %130, %131, %cst_44 {dimension_numbers = #tpu.dot_dimension_numbers<[1], [0], [0], [1], [0, 0, 1, 1], [], []>} : vector<8x32xbf16>, vector<32x32xbf16>, vector<8x32xf32> -> vector<8x32xf32>
    %c0_45 = arith.constant 0 : index
    %c0_46 = arith.constant 0 : index
    %133 = vector.load %arg7[%c0_45, %c0_46] : memref<1x32xf32, #tpu.memory_space<vmem>>, vector<1x32xf32>
    %134 = vector.shape_cast %133 : vector<1x32xf32> to vector<32xf32>
    %135 = vector.shape_cast %134 : vector<32xf32> to vector<1x32xf32>
    %136 = vector.broadcast %135 : vector<1x32xf32> to vector<8x32xf32>
    %137 = arith.addf %132, %136 : vector<8x32xf32>
    %138 = arith.addf %1, %137 : vector<8x32xf32>
    %cst_47 = arith.constant dense<0.000000e+00> : vector<8xf32>
    %139 = vector.multi_reduction <add>, %138, %cst_47 [1] : vector<8x32xf32> to vector<8xf32>
    %140 = vector.shape_cast %139 : vector<8xf32> to vector<8x1xf32>
    %cst_48 = arith.constant 3.200000e+01 : f32
    %141 = vector.broadcast %cst_48 : f32 to vector<8x1xf32>
    %142 = arith.divf %140, %141 : vector<8x1xf32>
    %143 = vector.broadcast %142 : vector<8x1xf32> to vector<8x32xf32>
    %144 = arith.subf %138, %143 : vector<8x32xf32>
    %145 = arith.mulf %144, %144 : vector<8x32xf32>
    %cst_49 = arith.constant dense<0.000000e+00> : vector<8xf32>
    %146 = vector.multi_reduction <add>, %145, %cst_49 [1] : vector<8x32xf32> to vector<8xf32>
    %147 = vector.shape_cast %146 : vector<8xf32> to vector<8x1xf32>
    %cst_50 = arith.constant 3.200000e+01 : f32
    %148 = vector.broadcast %cst_50 : f32 to vector<8x1xf32>
    %149 = arith.divf %147, %148 : vector<8x1xf32>
    %150 = vector.broadcast %142 : vector<8x1xf32> to vector<8x32xf32>
    %151 = arith.subf %138, %150 : vector<8x32xf32>
    %cst_51 = arith.constant 9.99999974E-6 : f32
    %152 = vector.broadcast %cst_51 : f32 to vector<8x1xf32>
    %153 = arith.addf %149, %152 : vector<8x1xf32>
    %154 = math.rsqrt %153 : vector<8x1xf32>
    %155 = vector.broadcast %154 : vector<8x1xf32> to vector<8x32xf32>
    %156 = arith.mulf %151, %155 : vector<8x32xf32>
    %c0_52 = arith.constant 0 : index
    %c0_53 = arith.constant 0 : index
    %157 = vector.load %arg8[%c0_52, %c0_53] : memref<1x32xf32, #tpu.memory_space<vmem>>, vector<1x32xf32>
    %158 = vector.shape_cast %157 : vector<1x32xf32> to vector<32xf32>
    %159 = vector.shape_cast %158 : vector<32xf32> to vector<1x32xf32>
    %160 = vector.broadcast %159 : vector<1x32xf32> to vector<8x32xf32>
    %161 = arith.mulf %156, %160 : vector<8x32xf32>
    %c0_54 = arith.constant 0 : index
    %c0_55 = arith.constant 0 : index
    %162 = vector.load %arg9[%c0_54, %c0_55] : memref<1x32xf32, #tpu.memory_space<vmem>>, vector<1x32xf32>
    %163 = vector.shape_cast %162 : vector<1x32xf32> to vector<32xf32>
    %164 = vector.shape_cast %163 : vector<32xf32> to vector<1x32xf32>
    %165 = vector.broadcast %164 : vector<1x32xf32> to vector<8x32xf32>
    %166 = arith.addf %161, %165 : vector<8x32xf32>
    %167 = arith.truncf %166 : vector<8x32xf32> to vector<8x32xbf16>
    %c0_56 = arith.constant 0 : index
    %c0_57 = arith.constant 0 : index
    %168 = vector.load %arg10[%c0_56, %c0_57] : memref<32x128xbf16, #tpu.memory_space<vmem>>, vector<32x128xbf16>
    %cst_58 = arith.constant dense<0.000000e+00> : vector<8x128xf32>
    %169 = tpu.matmul %167, %168, %cst_58 {dimension_numbers = #tpu.dot_dimension_numbers<[1], [0], [0], [1], [0, 0, 1, 1], [], []>} : vector<8x32xbf16>, vector<32x128xbf16>, vector<8x128xf32> -> vector<8x128xf32>
    %c0_59 = arith.constant 0 : index
    %c0_60 = arith.constant 0 : index
    %170 = vector.load %arg11[%c0_59, %c0_60] : memref<1x128xf32, #tpu.memory_space<vmem>>, vector<1x128xf32>
    %171 = vector.shape_cast %170 : vector<1x128xf32> to vector<128xf32>
    %172 = vector.shape_cast %171 : vector<128xf32> to vector<1x128xf32>
    %173 = vector.broadcast %172 : vector<1x128xf32> to vector<8x128xf32>
    %174 = arith.addf %169, %173 : vector<8x128xf32>
    %cst_61 = arith.constant 0.000000e+00 : f32
    %175 = vector.broadcast %cst_61 : f32 to vector<8x128xf32>
    %176 = arith.maximumf %174, %175 : vector<8x128xf32>
    %177 = arith.truncf %176 : vector<8x128xf32> to vector<8x128xbf16>
    %c0_62 = arith.constant 0 : index
    %c0_63 = arith.constant 0 : index
    %178 = vector.load %arg12[%c0_62, %c0_63] : memref<128x32xbf16, #tpu.memory_space<vmem>>, vector<128x32xbf16>
    %cst_64 = arith.constant dense<0.000000e+00> : vector<8x32xf32>
    %179 = tpu.matmul %177, %178, %cst_64 {dimension_numbers = #tpu.dot_dimension_numbers<[1], [0], [0], [1], [0, 0, 1, 1], [], []>} : vector<8x128xbf16>, vector<128x32xbf16>, vector<8x32xf32> -> vector<8x32xf32>
    %c0_65 = arith.constant 0 : index
    %c0_66 = arith.constant 0 : index
    %180 = vector.load %arg13[%c0_65, %c0_66] : memref<1x32xf32, #tpu.memory_space<vmem>>, vector<1x32xf32>
    %181 = vector.shape_cast %180 : vector<1x32xf32> to vector<32xf32>
    %182 = vector.shape_cast %181 : vector<32xf32> to vector<1x32xf32>
    %183 = vector.broadcast %182 : vector<1x32xf32> to vector<8x32xf32>
    %184 = arith.addf %179, %183 : vector<8x32xf32>
    %185 = arith.addf %138, %184 : vector<8x32xf32>
    %c0_67 = arith.constant 0 : index
    %c0_68 = arith.constant 0 : index
    %c0_69 = arith.constant 0 : index
    %186 = vector.load %arg14[%c0_67, %c0_68, %c0_69] : memref<1x8x32xf32, #tpu.memory_space<vmem>>, vector<1x8x32xf32>
    %187 = vector.shape_cast %186 : vector<1x8x32xf32> to vector<8x32xf32>
    %188 = vector.shape_cast %185 : vector<8x32xf32> to vector<1x8x32xf32>
    tpu.vector_store %arg14[%c0_67, %c0_68, %c0_69], %188 {strides = array<i32>} : memref<1x8x32xf32, #tpu.memory_space<vmem>>, vector<1x8x32xf32>,
    return
  }
  func.func @transform_0(%arg0: i32) -> (i32, i32, i32) {
    %c0_i32 = arith.constant 0 : i32
    %c0_i32_0 = arith.constant 0 : i32
    %c0_i32_1 = arith.constant 0 : i32
    return %arg0, %c0_i32, %c0_i32_0 : i32, i32, i32
  }
  func.func @transform_1(%arg0: i32) -> (i32, i32) {
    %c0_i32 = arith.constant 0 : i32
    %c0_i32_0 = arith.constant 0 : i32
    %c0_i32_1 = arith.constant 0 : i32
    return %c0_i32, %c0_i32_0 : i32, i32
  }
  func.func @transform_2(%arg0: i32) -> (i32, i32) {
    %c0_i32 = arith.constant 0 : i32
    %c0_i32_0 = arith.constant 0 : i32
    %c0_i32_1 = arith.constant 0 : i32
    return %c0_i32, %c0_i32_0 : i32, i32
  }
  func.func @transform_3(%arg0: i32) -> (i32, i32) {
    %c0_i32 = arith.constant 0 : i32
    %c0_i32_0 = arith.constant 0 : i32
    %c0_i32_1 = arith.constant 0 : i32
    return %c0_i32, %c0_i32_0 : i32, i32
  }
  func.func @transform_4(%arg0: i32) -> (i32, i32) {
    %c0_i32 = arith.constant 0 : i32
    %c0_i32_0 = arith.constant 0 : i32
    %c0_i32_1 = arith.constant 0 : i32
    return %c0_i32, %c0_i32_0 : i32, i32
  }
  func.func @transform_5(%arg0: i32) -> (i32, i32) {
    %c0_i32 = arith.constant 0 : i32
    %c0_i32_0 = arith.constant 0 : i32
    %c0_i32_1 = arith.constant 0 : i32
    return %c0_i32, %c0_i32_0 : i32, i32
  }
  func.func @transform_6(%arg0: i32) -> (i32, i32) {
    %c0_i32 = arith.constant 0 : i32
    %c0_i32_0 = arith.constant 0 : i32
    %c0_i32_1 = arith.constant 0 : i32
    return %c0_i32, %c0_i32_0 : i32, i32
  }
  func.func @transform_7(%arg0: i32) -> (i32, i32) {
    %c0_i32 = arith.constant 0 : i32
    %c0_i32_0 = arith.constant 0 : i32
    %c0_i32_1 = arith.constant 0 : i32
    return %c0_i32, %c0_i32_0 : i32, i32
  }
  func.func @transform_8(%arg0: i32) -> (i32, i32) {
    %c0_i32 = arith.constant 0 : i32
    %c0_i32_0 = arith.constant 0 : i32
    %c0_i32_1 = arith.constant 0 : i32
    return %c0_i32, %c0_i32_0 : i32, i32
  }
  func.func @transform_9(%arg0: i32) -> (i32, i32) {
    %c0_i32 = arith.constant 0 : i32
    %c0_i32_0 = arith.constant 0 : i32
    %c0_i32_1 = arith.constant 0 : i32
    return %c0_i32, %c0_i32_0 : i32, i32
  }
  func.func @transform_10(%arg0: i32) -> (i32, i32) {
    %c0_i32 = arith.constant 0 : i32
    %c0_i32_0 = arith.constant 0 : i32
    %c0_i32_1 = arith.constant 0 : i32
    return %c0_i32, %c0_i32_0 : i32, i32
  }
  func.func @transform_11(%arg0: i32) -> (i32, i32) {
    %c0_i32 = arith.constant 0 : i32
    %c0_i32_0 = arith.constant 0 : i32
    %c0_i32_1 = arith.constant 0 : i32
    return %c0_i32, %c0_i32_0 : i32, i32
  }
  func.func @transform_12(%arg0: i32) -> (i32, i32) {
    %c0_i32 = arith.constant 0 : i32
    %c0_i32_0 = arith.constant 0 : i32
    %c0_i32_1 = arith.constant 0 : i32
    return %c0_i32, %c0_i32_0 : i32, i32
  }
  func.func @transform_13(%arg0: i32) -> (i32, i32, i32) {
    %c0_i32 = arith.constant 0 : i32
    %c0_i32_0 = arith.constant 0 : i32
    %c0_i32_1 = arith.constant 0 : i32
    return %arg0, %c0_i32, %c0_i32_0 : i32, i32, i32
  }
}

</mosaic_0001>

<bundles_post_ra>
// kernel: tpu_custom_call.1
= control target key start
LH: loop header
LB: loop body
LE: loop exit
PB: predicated region body
PF: predicated region fallthrough
CT: control target
= control target key end

     0   :  { %s1570_s0 = inlined_call_operand.vmem [shape: f32[2,8,32], index: 0, kind: input, shape index: {}]   ;;  %s1571_s1 = inlined_call_operand.vmem [shape: f32[8,8], index: 1, kind: input, shape index: {}]   ;;  %s1572_s2 = inlined_call_operand.vmem [shape: f32[1,32], index: 2, kind: input, shape index: {}]   ;;  %s1573_s3 = inlined_call_operand.vmem [shape: f32[1,32], index: 3, kind: input, shape index: {}]   ;;  %s1574_s4 = inlined_call_operand.vmem [shape: bf16[32,96], index: 4, kind: input, shape index: {}]   ;;  %s1575_s5 = inlined_call_operand.vmem [shape: bf16[32,32], index: 5, kind: input, shape index: {}]   ;;  %s1576_s6 = inlined_call_operand.vmem [shape: f32[1,32], index: 6, kind: input, shape index: {}]   ;;  %s1577_s7 = inlined_call_operand.vmem [shape: f32[1,32], index: 7, kind: input, shape index: {}]   ;;  %s1578_s8 = inlined_call_operand.vmem [shape: f32[1,32], index: 8, kind: input, shape index: {}]   ;;  %s1579_s9 = inlined_call_operand.vmem [shape: bf16[32,128], index: 9, kind: input, shape index: {}]   ;;  %s1580_s10 = inlined_call_operand.vmem [shape: f32[1,128], index: 10, kind: input, shape index: {}]   ;;  %s1581_s11 = inlined_call_operand.vmem [shape: bf16[128,32], index: 11, kind: input, shape index: {}]   ;;  %s1582_s12 = inlined_call_operand.vmem [shape: f32[1,32], index: 12, kind: input, shape index: {}]   ;;  %s1583_s13 = inlined_call_operand.hbm [shape: f32[2,8,32], index: 13, kind: output, shape index: {}]  }
   0x1   :  { %1584 = sst [smem:[#allocation6_spill]] %s1570_s0 }
   0x2   :  { %1585 = sst [smem:[#allocation7_spill]] %s1571_s1 }
   0x3   :  { %1586 = sst [smem:[#allocation8_spill]] %s1572_s2 }
   0x4   :  { %1587 = sst [smem:[#allocation9_spill]] %s1573_s3 }
   0x5   :  { %18 = vsyncpa [#allocation4], 0 }
   0x6   :  { %20 = vsyncpa [#allocation4 + $0x1], 0  ;;  %s1356_s25 = smov 0   ;;  %s1358_s26 = smov 0  }
   0x7   :  { %s1360_s27 = smov 0   ;;  %s1362_s28 = smov 0  }
   0x8 LB: > { %s1377_s29 = sadd.s32 4294967295, %s1269_s28   ;;  %s1033_s30 = sadd.s32 4294967294, %s1269_s28   ;;  %s1269_s28 = sphi %s1362_s28, %s1597_s28   ;;  %s1265_s27 = sphi %s1360_s27, %s1596_s27   ;;  %s1261_s26 = sphi %s1358_s26, %s1595_s26   ;;  %s1257_s25 = sphi %s1356_s25, %s1594_s25  }
   0x9   : > { %s1381_s14 = sadd.s32 1, %s1269_s28   ;;  %s311_s15 = sadd.s32 1, %s1265_s27 }
   0xa   : > { %s308_s16 = ssub.s32 %s1269_s28, %s1381_s14  ;;  %p321_p0 = scmp.ne.s32.totalorder %s1265_s27, %s1261_s26 }
   0xb   : > { %p309_p1 = scmp.eq.s32.totalorder %s308_s16, 0  ;;  %p322_p2 = scmp.eq.s32.totalorder %s1377_s29, 1 }
   0xc   : > { %p327_p3 = scmp.ne.s32.totalorder %s1261_s26, %s1257_s25  ;;  %p328_p4 = scmp.eq.s32.totalorder %s1033_s30, 1 }
   0xd   : > { %s1392_s17 = scalar_select %p309_p1, %s1265_s27, %s311_s15  }
   0xe   : > { %p1394_p5 = por %p322_p2, %p321_p0  ;;  %p1398_p6 = por %p328_p4, %p327_p3 }
   0xf   : > { %p1036_p7 = scmp.ge.s32.totalorder %s1269_s28, 1  ;;  %p389_p8 = scmp.lt.s32.totalorder %s1269_s28, 3 }
  0x11   : > { %p390_p9 = pnand %p1036_p7, %p389_p8 }
  0x12   : > { %p432_p10 = scmp.lt.s32.totalorder (!%p390_p9), %s1377_s29, 1  ;;  %s1590_s0 = sld [smem:[#allocation6_spill]] (!%p390_p9) }
  0x13   : > { %393 = sbr.rel (%p390_p9) target bundleno = 2040 (0x7f8), region = 72  ;;  %s1591_s2 = sld [smem:[#allocation8_spill]] (!%p390_p9) }
  0x14   : > { %s1592_s3 = sld [smem:[#allocation9_spill]] (!%p390_p9)  ;;  %s1272_s30 = smov (!%p390_p9), 120  }
  0x15   : > { %s1273_s15 = smov (!%p390_p9), 64   ;;  %s1274_s16 = smov (!%p390_p9), 96  }
  0x16   : > { %s1277_s22 = smov (!%p390_p9), 56   ;;  %s1278_s23 = smov (!%p390_p9), 72  }
  0x17   : > { %s1593_s1 = sld [smem:[#allocation7_spill]] (!%p390_p9) }
  0x18   : > { %s433_s20 = scalar_select %p432_p10, %s1377_s29, 1  ;;  %vm438_vm0 = vcmask 261120   ;;  %v1271_v2 = vmov 32.0   ;;  %v1111_v14 = vld [vmem:[%s1574_s4 + $0x8] sm:$0xff]  ;;  %v1110_v15 = vld [vmem:[%s1574_s4] sm:$0xff]  ;;  %vm554_vm5 = vcmask 1043456  }
  0x19   : > { %1185 = vrcp.f32 %v1271_v2  ;;  %504 = vmatpush.bf16.msra.mxu0 %v1111_v14  ;;  %v1178_v25 = vld [vmem:[%s1591_s2] ss:$0 sm:$0xff]  ;;  %vm516_vm6 = vcmask 64512   ;;  %vm635_vm7 = vcmask 130112   ;;  %vm699_vm8 = vcmask 195712  }
  0x1a   : > { %s1038_s21 = sshll.u32 %s433_s20, 3  ;;  %v1179_v28 = vld [vmem:[%s1592_s3] ss:$0 sm:$0xff]  ;;  %s1275_s20 = smov 112   ;;  %vm763_vm9 = vcmask 261312  }
  0x1b   : > { %s435_s24 = scalar_lea.vmem %s1590_s0, %s1038_s21  ;;  %s1276_s21 = smov 88  }
  0x1c   : > { %v1409_v0 = vld [vmem:[%s435_s24] sm:$0xff]  ;;  %s1279_s24 = smov 104  }
  0x1d   : > { %v439_v1 = vsel %vm438_vm0, %v1409_v0, 0.0  ;;  %505 = vmatpush.bf16.msra.mxu0 %v1110_v15  ;;  %v511_v51 = vld [vmem:[%s1593_s1] sm:$0xff] }
  0x1e   : > { %440 = vadd.xlane.f32.xlu0 %v439_v1 }
  0x1f   : > { %v1186_v3 = vpop.eup %1185 }
  0x20   : > { %v443_v4 = vmul.f32 32.0, %v1186_v3  ;;  %vm447_vm1 = vweird.f32 %v1186_v3 }
  0x22   : > { %v444_v5 = vsub.f32 1.0, %v443_v4 }
  0x24   : > { %v445_v6 = vmul.f32 %v1186_v3, %v444_v5 }
  0x26   : > { %v446_v7 = vadd.f32 %v1186_v3, %v445_v6 }
  0x28   : > { %v1413_v8 = vsel %vm447_vm1, %v1186_v3, %v446_v7 }
  0x91   : > { %v441_v9 = vpop.xlane.xlu0 %440 }
  0x92   : > { %v449_v10 = vmul.f32 %v1413_v8, %v441_v9 }
  0x94   : > { %v450_v11 = vsub.f32 %v1409_v0, %v449_v10 }
  0x96   : > { %v451_v12 = vmul.f32 %v450_v11, %v450_v11 }
  0x98   : > { %v452_v13 = vsel %vm438_vm0, %v451_v12, 0.0 }
  0x99   : > { %453 = vadd.xlane.f32.xlu0 %v452_v13 }
 0x10c   : > { %v454_v16 = vpop.xlane.xlu0 %453 }
 0x10d   : > { %v455_v17 = vmul.f32 %v454_v16, %v1413_v8 }
 0x10f   : > { %v456_v18 = vadd.f32 1e-05, %v455_v17 }
 0x111   : > { %1187 = vrsqrt.f32 %v456_v18  ;;  %vm463_vm3 = vweird.f32 %v456_v18 }
 0x117   : > { %v1188_v19 = vpop.eup %1187 }
 0x118   : > { %v458_v20 = vmul.f32 %v1188_v19, %v456_v18  ;;  %vm464_vm2 = vweird.f32 %v1188_v19 }
 0x119   : > { %vm465_vm4 = vmor %vm463_vm3, %vm464_vm2 }
 0x11a   : > { %v459_v21 = vmul.f32 %v1188_v19, %v458_v20 }
 0x11c   : > { %v460_v22 = vmul.f32 0.5, %v459_v21 }
 0x11e   : > { %v461_v23 = vsub.f32 1.5, %v460_v22 }
 0x120   : > { %v462_v24 = vmul.f32 %v1188_v19, %v461_v23 }
 0x122   : > { %v466_v26 = vsel %vm465_vm4, %v1188_v19, %v462_v24 }
 0x123   : > { %v467_v27 = vmul.f32 %v466_v26, %v450_v11 }
 0x125   : > { %v472_v29 = vmul.f32 %v1178_v25, %v467_v27 }
 0x127   : > { %v477_v30 = vadd.f32 %v1179_v28, %v472_v29 }
 0x129   : > { %v478_v31 = vpack.c.bf16 %v477_v30, %v477_v30 }
 0x12b   : > { %1047 = vmatmul.msk.bf16.vlgmr.msra.gmra.mxu0 %vm438_vm0, %v478_v31 }
 0x1a8   : > { %v507_v32 = vpop.f32.mrf.mxu0 }
 0x1a9   : > { %v1432_v33 = vpack.c.bf16 %v507_v32, %v507_v32 }
 0x1ab   : > { %573 = vrot.lane.b32.xlu0 %v1432_v33, %s1272_s30  ;;  %549 = vrot.lane.b32.xlu2 %v1432_v33, %s1273_s15  ;;  %s1280_s30 = smov 80  }
 0x1ac   : > { %514 = vrot.lane.b32.xlu1 %v1432_v33, %s1274_s16  ;;  %s1107_s16 = sshll.u32 %s1377_s29, 3 }
 0x1ad   : > { %s969_s1 = scalar_lea.hbm %s1583_s13, %s1107_s16 }
 0x1ae   : > { %s973_s2 = sshll.u32 %s969_s1, 4  ;;  %s974_s2 = int_to_ptr.hbm [resolvable:$true] %s973_s2 }
 0x1af   : > { %s1221_s3 = sshra.s32 %s974_s2, 4  ;;  %s1222_s3 = int_to_ptr.hbm [resolvable:$true] %s1221_s3 }
 0x1b0   : > { %v509_v34 = vpop.f32.mrf.mxu0  ;;  %s1223_s0 = scalar_lea.hbm %s1222_s3, 8  ;;  %p1228_p0 = scmp.lt.s32.totalorder %s1222_s3, %s1583_s13 }
 0x1b1   : > { %p1224_p11 = scmp.ne.s32.totalorder %s1222_s3, %s1223_s0 }
 0x1b3   : > { %637 = vrot.lane.b32.xlu0 %v1432_v33, %s1275_s20  ;;  %575 = vrot.lane.b32.xlu2 %v1432_v33, %s1276_s21  ;;  %s1281_s20 = smov 40   ;;  %s1282_s21 = smov 48  }
 0x1b4   : > { %p1225_p12 = pnand %p1224_p11, %p1394_p5 }
 0x1b6   : > { %p1226_p13 = pneg %p1225_p12 }
 0x1bb   : > { %609 = vrot.lane.b32.xlu0 %v1432_v33, %s1277_s22  ;;  %703 = vrot.lane.b32.xlu2 %v1432_v33, %s1278_s23  ;;  %s1283_s22 = smov 16   ;;  %s1284_s23 = smov 8  }
 0x1c3   : > { %701 = vrot.lane.b32.xlu2 %v1432_v33, %s1279_s24  ;;  %s1285_s24 = smov 24  }
 0x1cb   : > { %639 = vrot.lane.b32.xlu2 %v1432_v33, %s1280_s30  ;;  %s429_s30 = sand.u32 1, %s1261_s26  }
 0x1cc   : > { %s1037_s15 = sshll.u32 %s429_s30, 3  ;;  %s959_s29 = scalar_lea.sflag [#allocation4], %s429_s30 }
 0x205   : > { %v550_v35 = vpop.permute.xlu2 %549 }
 0x206   : > { %v556_v36 = vsel %vm554_vm5, %v550_v35, 0 }
 0x207   : > { %565 = vmatpush.bf16.msra.mxu2 %v556_v36 }
 0x20d   : > { %v576_v37 = vpop.permute.xlu2 %575 }
 0x20e   : > { %v581_v38 = vsel %vm516_vm6, %v576_v37, 0 }
 0x20f   : > { %590 = vmatpush.bf16.xpose.msrb.mxu2 %v581_v38 }
 0x215   : > { %v704_v39 = vpop.permute.xlu2 %703 }
 0x216   : > { %v709_v40 = vsel %vm516_vm6, %v704_v39, 0 }
 0x217   : > { %718 = vmatpush.bf16.xpose.msra.mxu3 %v709_v40 }
 0x21d   : > { %v702_v41 = vpop.permute.xlu2 %701  ;;  %v574_v44 = vpop.permute.xlu0 %573 }
 0x21e   : > { %v515_v42 = vpop.permute.xlu1 %514  ;;  %1054 = vmatmul.msk.bf16.vlgmr.msra.gmra.mxu3 %vm516_vm6, %v702_v41 }
 0x21f   : > { %v521_v43 = vsel %vm516_vm6, %v515_v42, 0 }
 0x220   : > { %530 = vmatpush.bf16.xpose.msra.mxu1 %v521_v43 }
 0x225   : > { %v640_v45 = vpop.permute.xlu2 %639  ;;  %v638_v47 = vpop.permute.xlu0 %637 }
 0x226   : > { %v645_v46 = vsel %vm516_vm6, %v640_v45, 0 }
 0x227   : > { %1048 = vmatmul.msk.bf16.vlgmr.msra.gmra.mxu1 %vm516_vm6, %v1432_v33  ;;  %654 = vmatpush.bf16.xpose.msrb.mxu0 %v645_v46 }
 0x22d   : > { %v610_v1 = vpop.permute.xlu0 %609 }
 0x22e   : > { %1052 = vmatmul.msk.bf16.vlgmr.msrb.gmra.mxu0 %vm516_vm6, %v638_v47  ;;  %v615_v13 = vsel %vm554_vm5, %v610_v1, 0  ;;  %v1180_v1 = vld [vmem:[%s1576_s6] ss:$0 sm:$0xff] }
 0x2a1   : > { %v720_v48 = vpop.f32.mrf.mxu3 }
 0x2a2   : > { %v724_v53 = vmul.f32 0.17677669, %v720_v48 }
 0x2a4   : > { %v532_v49 = vpop.f32.mrf.mxu1  ;;  %v725_v59 = vadd.f32 %v724_v53, %v511_v51 }
 0x2a5   : > { %v536_v50 = vmul.f32 0.17677669, %v532_v49 }
 0x2a6   : > { %v726_v62 = vsel %vm516_vm6, %v725_v59, -inf }
 0x2a7   : > { %v537_v52 = vadd.f32 %v536_v50, %v511_v51 }
 0x2a9   : > { %v722_v54 = vpop.f32.mrf.mxu3  ;;  %v538_v55 = vsel %vm516_vm6, %v537_v52, -inf }
 0x2aa   : > { %539 = vmax.xlane.f32.xlu1 %v538_v55 }
 0x2ab   : > { %v656_v56 = vpop.f32.mrf.mxu0 }
 0x2ac   : > { %v534_v57 = vpop.f32.mrf.mxu1  ;;  %v660_v58 = vmul.f32 0.17677669, %v656_v56 }
 0x2ad   : > { %v1113_v57 = vld [vmem:[%s1575_s5 + $0x8] sm:$0xff] }
 0x2ae   : > { %v661_v60 = vadd.f32 %v660_v58, %v511_v51  ;;  %796 = vmatpush.bf16.msra.mxu0 %v1113_v57  ;;  %v1112_v58 = vld [vmem:[%s1575_s5] sm:$0xff] }
 0x2b0   : > { %v662_v61 = vsel %vm516_vm6, %v661_v60, -inf }
 0x2b1   : > { %663 = vmax.xlane.f32.xlu0 %v662_v61 }
 0x2b2   : > { %727 = vmax.xlane.f32.xlu1 %v726_v62  ;;  %797 = vmatpush.bf16.msra.mxu0 %v1112_v58 }
 0x2b3   : > { %v658_v63 = vpop.f32.mrf.mxu0 }
 0x2cb   : > { %737 = vrot.lane.b32.xlu1 %v1432_v33, %s1281_s20 }
 0x31d   : > { %v540_v2 = vpop.xlane.xlu1 %539 }
 0x31e   : > { %v541_v3 = vsub.f32 %v537_v52, %v540_v2 }
 0x320   : > { %v542_v4 = vmul.f32 1.442695, %v541_v3 }
 0x322   : > { %1189 = vpow2.f32 %v542_v4 }
 0x324   : > { %v664_v5 = vpop.xlane.xlu0 %663 }
 0x325   : > { %v728_v6 = vpop.xlane.xlu1 %727  ;;  %v665_v7 = vsub.f32 %v661_v60, %v664_v5 }
 0x326   : > { %v729_v9 = vsub.f32 %v725_v59, %v728_v6 }
 0x327   : > { %v666_v10 = vmul.f32 1.442695, %v665_v7 }
 0x328   : > { %v1190_v11 = vpop.eup %1189  ;;  %v730_v14 = vmul.f32 1.442695, %v729_v9 }
 0x329   : > { %1191 = vpow2.f32 %v666_v10  ;;  %v548_v12 = vpack.c.bf16 %v1190_v11, %v1190_v11  ;;  %v544_v28 = vsel %vm516_vm6, %v1190_v11, 0.0 }
 0x32a   : > { %1193 = vpow2.f32 %v730_v14  ;;  %v1123_v14 = vld [vmem:[%s1581_s11 + $0x38] sm:$0xff] }
 0x32b   : > { %1049 = vmatmul.msk.bf16.vlgmr.msra.gmra.mxu2 %vm516_vm6, %v548_v12  ;;  %943 = vmatpush.bf16.msrb.mxu3 %v1123_v14 }
 0x32c   : > { %624 = vmatpush.bf16.msra.mxu2 %v615_v13  ;;  %v1115_v13 = vld [vmem:[%s1579_s9 + $0x8] sm:$0xff] }
 0x32f   : > { %v1192_v15 = vpop.eup %1191 }
 0x330   : > { %v668_v16 = vsel %vm516_vm6, %v1192_v15, 0.0  ;;  %v1194_v17 = vpop.eup %1193  ;;  %v672_v36 = vpack.c.bf16 %v1192_v15, %v1192_v15 }
 0x331   : > { %669 = vadd.xlane.f32.xlu0 %v668_v16  ;;  %v732_v18 = vsel %vm516_vm6, %v1194_v17, 0.0 }
 0x339   : > { %733 = vadd.xlane.f32.xlu0 %v732_v18 }
 0x33b   : > { %1050 = vmatmul.msk.bf16.vlgmr.msrb.gmra.mxu2 %vm516_vm6, %v574_v44 }
 0x33d   : > { %v738_v19 = vpop.permute.xlu1 %737 }
 0x33e   : > { %v743_v20 = vsel %vm554_vm5, %v738_v19, 0  ;;  %v1121_v19 = vld [vmem:[%s1581_s11 + $0x28] sm:$0xff] }
 0x33f   : > { %752 = vmatpush.bf16.msrb.mxu2 %v743_v20  ;;  %v1120_v20 = vld [vmem:[%s1581_s11 + $0x20] sm:$0xff] }
 0x3a4   : > { %v670_v42 = vpop.xlane.xlu0 %669 }
 0x3ae   : > { %v567_v21 = vpop.f32.mrf.mxu2 }
 0x3b6   : > { %v569_v22 = vpop.f32.mrf.mxu2 }
 0x3be   : > { %v592_v23 = vpop.f32.mrf.mxu2 }
 0x3bf   : > { %v596_v24 = vmul.f32 0.17677669, %v592_v23 }
 0x3c1   : > { %v597_v25 = vadd.f32 %v596_v24, %v511_v51  ;;  %v734_v51 = vpop.xlane.xlu0 %733 }
 0x3c3   : > { %v598_v26 = vsel %vm516_vm6, %v597_v25, -inf }
 0x3c4   : > { %599 = vmax.xlane.f32.xlu2 %v598_v26 }
 0x3c6   : > { %v594_v27 = vpop.f32.mrf.mxu2 }
 0x3dc   : > { %673 = vrot.lane.b32.xlu2 %v1432_v33, %s1282_s21  ;;  %v736_v33 = vpack.c.bf16 %v1194_v17, %v1194_v17  ;;  %v1122_v17 = vld [vmem:[%s1581_s11 + $0x30] sm:$0xff] }
 0x3dd   : > { %944 = vmatpush.bf16.msrb.mxu3 %v1122_v17 }
 0x3e1   : > { %945 = vmatpush.bf16.msrb.mxu3 %v1121_v19 }
 0x3e5   : > { %946 = vmatpush.bf16.msrb.mxu3 %v1120_v20 }
 0x405   : > { %545 = vadd.xlane.f32.xlu2 %v544_v28  ;;  %v1181_v28 = vld [vmem:[%s1577_s7] ss:$0 sm:$0xff] }
 0x437   : > { %v600_v29 = vpop.xlane.xlu2 %599 }
 0x438   : > { %v601_v30 = vsub.f32 %v597_v25, %v600_v29  ;;  %v1118_v25 = vld [vmem:[%s1581_s11 + $0x10] sm:$0xff] }
 0x43a   : > { %v602_v31 = vmul.f32 1.442695, %v601_v30 }
 0x43c   : > { %1195 = vpow2.f32 %v602_v31  ;;  %v1182_v31 = vld [vmem:[%s1578_s8] ss:$0 sm:$0xff] }
 0x43f   : > { %v674_v32 = vpop.permute.xlu2 %673 }
 0x440   : > { %v679_v34 = vsel %vm554_vm5, %v674_v32, 0 }
 0x441   : > { %688 = vmatpush.bf16.msrb.mxu1 %v679_v34 }
 0x442   : > { %v1196_v35 = vpop.eup %1195 }
 0x443   : > { %v608_v37 = vpack.c.bf16 %v1196_v35, %v1196_v35  ;;  %v604_v38 = vsel %vm516_vm6, %v1196_v35, 0.0 }
 0x444   : > { %605 = vadd.xlane.f32.xlu1 %v604_v38  ;;  %1053 = vmatmul.msk.bf16.vlgmr.msrb.gmra.mxu1 %vm516_vm6, %v672_v36  ;;  %v1117_v36 = vld [vmem:[%s1581_s11 + $0x8] sm:$0xff]  ;;  %v1183_v38 = vld [vmem:[%s1580_s10] ss:$0 sm:$0xff] }
 0x445   : > { %1051 = vmatmul.msk.bf16.vlgmr.msra.gmra.mxu2 %vm516_vm6, %v608_v37  ;;  %866 = vmatpush.bf16.msra.mxu1 %v1115_v13  ;;  %v1116_v37 = vld [vmem:[%s1581_s11] sm:$0xff] }
 0x455   : > { %1055 = vmatmul.msk.bf16.vlgmr.msrb.gmra.mxu2 %vm516_vm6, %v736_v33 }
 0x478   : > { %v546_v39 = vpop.xlane.xlu2 %545 }
 0x479   : > { %1197 = vrcp.f32 %v546_v39 }
 0x47a   : > { %1199 = vrcp.f32 %v670_v42 }
 0x47f   : > { %v1198_v40 = vpop.eup %1197 }
 0x480   : > { %v571_v41 = vmul.f32 %v1198_v40, %v567_v21  ;;  %v1200_v44 = vpop.eup %1199 }
 0x482   : > { %572 = vst.msk [vmem:[#allocation2] sm:$0xff] %vm516_vm6, %v571_v41 }
 0x4b7   : > { %v606_v43 = vpop.xlane.xlu1 %605 }
 0x4b8   : > { %1201 = vrcp.f32 %v606_v43  ;;  %v1184_v43 = vld [vmem:[%s1582_s12] ss:$0 sm:$0xff] }
 0x4b9   : > { %1203 = vrcp.f32 %v734_v51 }
 0x4be   : > { %v1202_v47 = vpop.eup %1201 }
 0x4bf   : > { %v1204_v53 = vpop.eup %1203 }
 0x4c1   : > { %v690_v45 = vpop.f32.mrf.mxu1 }
 0x4c2   : > { %v694_v46 = vmul.f32 %v1200_v44, %v690_v45 }
 0x4c4   : > { %696 = vrot.lane.b32.xlu1 %v694_v46, %s1283_s22 }
 0x4c8   : > { %v626_v48 = vpop.f32.mrf.mxu2 }
 0x4c9   : > { %v630_v49 = vmul.f32 %v1202_v47, %v626_v48  ;;  %v692_v50 = vpop.f32.mrf.mxu1 }
 0x4cb   : > { %632 = vrot.lane.b32.xlu0 %v630_v49, %s1284_s23  ;;  %s431_s23 = scalar_lea.vmem [#allocation3], %s1037_s15  ;;  %s1227_s15 = scalar_lea.hbm %s1583_s13, 16 }
 0x4cc   : > { %p1229_p1 = scmp.lt.s32.totalorder %s1227_s15, %s1223_s0 }
 0x4ce   : > { %p1230_p2 = por %p1229_p1, %p1228_p0 }
 0x4d0   : > { %v628_v52 = vpop.f32.mrf.mxu2  ;;  %p1231_p3 = pnand %p1230_p2, %p1226_p13 }
 0x4d8   : > { %v754_v54 = vpop.f32.mrf.mxu2 }
 0x4d9   : > { %v758_v55 = vmul.f32 %v1204_v53, %v754_v54 }
 0x4db   : > { %760 = vrot.lane.b32.xlu0 %v758_v55, %s1285_s24  ;;  %s971_s24 = sshll.u32 %s431_s23, 4  ;;  %s972_s24 = int_to_ptr.vmem [resolvable:$true] %s971_s24 }
 0x4e0   : > { %v756_v56 = vpop.f32.mrf.mxu2 }
 0x536   : > { %v697_v60 = vpop.permute.xlu1 %696 }
 0x53d   : > { %v633_v59 = vpop.permute.xlu0 %632 }
 0x53e   : > { %636 = vst.msk [vmem:[#allocation2] sm:$0xff] %vm635_vm7, %v633_v59 }
 0x53f   : > { %700 = vst.msk [vmem:[#allocation2] sm:$0xff] %vm699_vm8, %v697_v60 }
 0x54d   : > { %v761_v61 = vpop.permute.xlu0 %760 }
 0x54e   : > { %764 = vst.msk [vmem:[#allocation2] sm:$0xff] %vm763_vm9, %v761_v61 }
 0x555   : > { %v765_v62 = vld [vmem:[#allocation2] sm:$0xff] }
 0x556   : > { %v766_v63 = vpack.c.bf16 %v765_v62, %v765_v62 }
 0x558   : > { %1064 = vmatmul.msk.bf16.vlgmr.msra.gmra.mxu0 %vm438_vm0, %v766_v63 }
 0x5d5   : > { %v799_v2 = vpop.f32.mrf.mxu0 }
 0x5d6   : > { %v800_v3 = vadd.f32 %v1180_v1, %v799_v2 }
 0x5d8   : > { %v1485_v4 = vadd.f32 %v800_v3, %v1409_v0  ;;  %v1114_v0 = vld [vmem:[%s1579_s9] sm:$0xff] }
 0x5d9   : > { %867 = vmatpush.bf16.msra.mxu1 %v1114_v0 }
 0x5da   : > { %v804_v5 = vsel %vm438_vm0, %v1485_v4, 0.0 }
 0x5db   : > { %805 = vadd.xlane.f32.xlu0 %v804_v5 }
 0x5dd   : > { %v801_v6 = vpop.f32.mrf.mxu0 }
 0x64e   : > { %v806_v7 = vpop.xlane.xlu0 %805 }
 0x64f   : > { %v807_v9 = vmul.f32 %v806_v7, %v1413_v8 }
 0x651   : > { %v808_v10 = vsub.f32 %v1485_v4, %v807_v9 }
 0x653   : > { %v809_v11 = vmul.f32 %v808_v10, %v808_v10 }
 0x655   : > { %v810_v12 = vsel %vm438_vm0, %v809_v11, 0.0 }
 0x656   : > { %811 = vadd.xlane.f32.xlu2 %v810_v12 }
 0x6c9   : > { %v812_v15 = vpop.xlane.xlu2 %811 }
 0x6ca   : > { %v813_v16 = vmul.f32 %v812_v15, %v1413_v8  ;;  %v1119_v8 = vld [vmem:[%s1581_s11 + $0x18] sm:$0xff] }
 0x6cb   : > { %947 = vmatpush.bf16.msrb.mxu3 %v1119_v8 }
 0x6cc   : > { %v814_v18 = vadd.f32 1e-05, %v813_v16 }
 0x6ce   : > { %1205 = vrsqrt.f32 %v814_v18  ;;  %vm821_vm11 = vweird.f32 %v814_v18 }
 0x6cf   : > { %948 = vmatpush.bf16.msrb.mxu3 %v1118_v25 }
 0x6d3   : > { %949 = vmatpush.bf16.msrb.mxu3 %v1117_v36 }
 0x6d4   : > { %v1206_v21 = vpop.eup %1205 }
 0x6d5   : > { %v816_v22 = vmul.f32 %v1206_v21, %v814_v18  ;;  %vm822_vm10 = vweird.f32 %v1206_v21 }
 0x6d6   : > { %vm823_vm12 = vmor %vm821_vm11, %vm822_vm10 }
 0x6d7   : > { %v817_v23 = vmul.f32 %v1206_v21, %v816_v22  ;;  %950 = vmatpush.bf16.msrb.mxu3 %v1116_v37 }
 0x6d9   : > { %v818_v24 = vmul.f32 0.5, %v817_v23 }
 0x6db   : > { %v819_v26 = vsub.f32 1.5, %v818_v24 }
 0x6dd   : > { %v820_v27 = vmul.f32 %v1206_v21, %v819_v26 }
 0x6df   : > { %v824_v29 = vsel %vm823_vm12, %v1206_v21, %v820_v27 }
 0x6e0   : > { %v825_v30 = vmul.f32 %v824_v29, %v808_v10 }
 0x6e2   : > { %v830_v32 = vmul.f32 %v1181_v28, %v825_v30 }
 0x6e4   : > { %v835_v34 = vadd.f32 %v1182_v31, %v830_v32 }
 0x6e6   : > { %v836_v35 = vpack.c.bf16 %v835_v34, %v835_v34 }
 0x6e8   : > { %1073 = vmatmul.msk.bf16.vlgmr.msra.gmra.mxu1 %vm438_vm0, %v836_v35 }
 0x765   : > { %v869_v33 = vpop.f32.mrf.mxu1 }
 0x766   : > { %v870_v39 = vadd.f32 %v1183_v38, %v869_v33 }
 0x768   : > { %v873_v40 = vmax.f32 %v870_v39, 0.0 }
 0x76a   : > { %v874_v41 = vpack.c.bf16 %v873_v40, %v873_v40 }
 0x76c   : > { %951 = vmatmul.bf16.vlgmr.msrb.gmra.mxu3 %v874_v41 }
 0x76d   : > { %v871_v42 = vpop.f32.mrf.mxu1 }
 0x7ef   : > { %v952_v44 = vpop.f32.mrf.mxu3 }
 0x7f0   : > { %v953_v45 = vadd.f32 %v1184_v43, %v952_v44 }
 0x7f2   : > { %v956_v46 = vadd.f32 %v953_v45, %v1485_v4 }
 0x7f4   : > { %957 = vst.msk [vmem:[%s431_s23] sm:$0xff] %vm438_vm0, %v956_v46 }
 0x7f5   : > { %1234 = shalt.err (!%p1231_p3)
}
 0x7f6   : > { %1124 = dma.vmem_to_hbm [thread:$0]  (%p1394_p5), %s972_s24, 128, %s974_s2, %s959_s29  }
 0x7f7   : > { %v954_v47 = vpop.f32.mrf.mxu3 }
 0x7f8 PF: > { %p1130_p4 = scmp.ge.s32.totalorder %s1269_s28, 2  ;;  %s985_s30 = sand.u32 1, %s1257_s25  }
 0x7f9   : > { %s986_s22 = scalar_lea.sflag [#allocation4], %s985_s30 }
 0x7fa   : > { %p1127_p7 = pnand %p1130_p4, %p1398_p6 }
 0x7fc   : > { %p1128_p8 = pneg %p1127_p7 }
 0x7fe   : > { %1252 = dma.done.wait (%p1128_p8), %s986_s22, 128  }
 0x7ff   : > { %1254 = vsyncadd (%p1128_p8), %s986_s22, 4294967168  ;;  %p23_p9 = scmp.ge.s32.totalorder %s1381_s14, 4   ;;  %s1594_s25 = smov %s1261_s26 }
 0x800   : > { %s1595_s26 = smov %s1265_s27  ;;  %s1596_s27 = smov %s1392_s17 }
 0x801   : > { %s1597_s28 = smov %s1381_s14  ;;  %25 = sbr.rel (!%p23_p9) target bundleno = 8 (0x8), region = 107 }
 0x806   :  { %992 = vsyncpa [#allocation4], 1 }
 0x807   :  { %994 = vsyncpa [#allocation4 + $0x1], 1 }

</bundles_post_ra>
